<compile_context>
chip_gen: v7x
topology: tpu7x:2x2x1
jax: 0.10.0
libtpu: 0.0.40
codegen_flags: <defaults>
</compile_context>

<pallas_src>
import functools

import jax
import jax.numpy as jnp
from jax.experimental import pallas as pl
from jax.experimental.pallas import tpu as pltpu


def _round_up(x, m):
    return ((x + m - 1) // m) * m


def _cdiv(a, b):
    return -(-a // b)


def dbmatch_kernel(x_ref, w_ref, b1_ref, w2_ref, c_ref, o_ref, *, wp, chunk):
    # x_ref : (1, 1, Cin, (tH+3)*Wp) bf16  padded-image row tile, rows flattened
    #         onto the lane axis (row stride = Wp lanes); includes 2 halo rows
    #         plus 1 slack row so the dx window never reads out of bounds.
    # w_ref : (9, Ch, Cin) bf16  conv taps, tap index = dy*3 + dx (transposed).
    # b1_ref: (Ch, 1) f32        conv bias (per channel, on sublanes).
    # w2_ref: (Ch, 1) f32        1x1 logit-head weights.
    # c_ref : (1, 1)  f32 SMEM   fused scalar (head bias b2 - debias).
    # o_ref : (1, 1, 1, tH*Wp) probabilities (lane dense, cropped wrapper-side).
    n_out = o_ref.shape[-1]
    n_sub = n_out // chunk

    taps = [w_ref[k] for k in range(9)]        # 9 x (Ch, Cin), tiny, hoisted
    b1 = b1_ref[...]                           # (Ch, 1)
    w2 = w2_ref[...]                           # (Ch, 1)
    c = c_ref[0, 0]                            # scalar (b2 - debias)

    @pl.loop(0, n_sub)
    def _(s):
        base = pl.multiple_of(s * chunk, 128)
        acc = None
        for dy in range(3):
            start = pl.multiple_of(base + dy * wp, 128)
            # One aligned window per tap-row; the 3 dx taps reuse it.
            win = x_ref[0, 0, :, pl.ds(start, chunk + 128)]   # (Cin, chunk+128)
            for dx in range(3):
                rhs = win[:, dx:dx + chunk]                   # (Cin, chunk)
                part = jnp.dot(taps[dy * 3 + dx], rhs,
                               preferred_element_type=jnp.float32)
                acc = part if acc is None else acc + part     # (Ch, chunk) f32
        feat = jnp.maximum(acc + b1, 0.0)                     # conv bias + ReLU
        # 1x1 head: VPU multiply + sublane reduce (keeps a width-1 matmul
        # off the MXU and the result lane dense).
        logit = jnp.sum(feat * w2, axis=0, keepdims=True) + c  # (1, chunk)
        o_ref[0, 0, :, pl.ds(base, chunk)] = (
            jax.nn.sigmoid(logit).astype(o_ref.dtype))


def dbmatch_forward(image_nchw, w1, b1, w2, b2, debias, *,
                    out_dtype=jnp.float32, target_lanes=65536):
    """image_nchw: (N, Cin, H, W) float32 -> prob: (N, 1, H, W) out_dtype."""
    N, Cin, H, W = image_nchw.shape
    Ch = w1.shape[3]

    # ---- tiling -------------------------------------------------------------
    wp = _round_up(W + 2, 128)                 # lane-dense padded row stride
    rc = max(1, 512 // wp)                     # rows per compute chunk
    chunk = rc * wp                            # ~512 lanes -> acc stays in vregs
    rows_target = max(rc, ((target_lanes // wp) // rc) * rc)
    n_t = max(1, _cdiv(H, rows_target))
    if N == 1 and n_t == 1 and H > rc:
        n_t = 2                                # keep both v7x TensorCores busy
    t_h = max(rc, _round_up(_cdiv(H, n_t), rc))
    h_p = _round_up(H, t_h)
    n_t = h_p // t_h

    # ---- wrapper-side layout: one bf16 pad pass, NO im2col -------------------
    xb = image_nchw.astype(jnp.bfloat16)                        # (N, Cin, H, W)
    base = jnp.pad(xb, ((0, 0), (0, 0),
                        (1, h_p + 2 - H),                       # conv + tile pad
                        (1, wp - 1 - W)))                       # conv + lane pad
    # Row tiles carrying their own halo (2 rows) + 1 slack row.
    tiles = [base[:, :, t * t_h: t * t_h + t_h + 3, :] for t in range(n_t)]
    x_tiled = jnp.stack(tiles, axis=1)                    # (N, T, Cin, tH+3, Wp)
    x_tiled = x_tiled.reshape(N, n_t, Cin, (t_h + 3) * wp)

    w_taps = jnp.transpose(w1.reshape(9, Cin, Ch), (0, 2, 1)).astype(jnp.bfloat16)
    b1_c = b1.reshape(Ch, 1).astype(jnp.float32)
    w2_c = w2.reshape(Ch, 1).astype(jnp.float32)
    # Fold the head bias and the debias parameter into one SMEM scalar.
    c = (b2.astype(jnp.float32).reshape(()) -
         jnp.asarray(debias, jnp.float32)).reshape(1, 1)

    kernel = functools.partial(dbmatch_kernel, wp=wp, chunk=chunk)
    flops = 2 * N * h_p * wp * Ch * (9 * Cin + 1)
    bytes_accessed = (x_tiled.size * 2 + N * n_t * t_h * wp * 4
                      + w_taps.size * 2 + (2 * Ch + 1) * 4)

    out = pl.pallas_call(
        kernel,
        out_shape=jax.ShapeDtypeStruct((N, n_t, 1, t_h * wp), out_dtype),
        grid_spec=pltpu.PrefetchScalarGridSpec(
            num_scalar_prefetch=0,
            grid=(N, n_t),
            in_specs=[
                # NOTE: add pipeline_mode=pl.Buffered(3) here if v7x profiling
                # shows exposed DMA at this tile size.
                pl.BlockSpec((1, 1, Cin, (t_h + 3) * wp),
                             lambda n, t: (n, t, 0, 0)),
                pl.BlockSpec((9, Ch, Cin), lambda n, t: (0, 0, 0)),
                pl.BlockSpec((Ch, 1), lambda n, t: (0, 0)),
                pl.BlockSpec((Ch, 1), lambda n, t: (0, 0)),
                pl.BlockSpec(memory_space=pltpu.MemorySpace.SMEM),
            ],
            out_specs=pl.BlockSpec((1, 1, 1, t_h * wp),
                                   lambda n, t: (n, t, 0, 0)),
        ),
        compiler_params=pltpu.CompilerParams(
            dimension_semantics=("parallel", "parallel"),
            vmem_limit_bytes=32 * 1024 * 1024,
        ),
        cost_estimate=pl.CostEstimate(flops=int(flops),
                                      transcendentals=int(N * h_p * wp),
                                      bytes_accessed=int(bytes_accessed)),
    )(x_tiled, w_taps, b1_c, w2_c, c)

    # Crop the lane / row padding and return NCHW like the PyTorch module.
    prob = out.reshape(N, h_p, wp)[:, :H, :W].reshape(N, 1, H, W)
    return prob


if __name__ == "__main__":
    # Small shapes consistent with the module's forward (binary segmentation).
    N, Cin, H, W = 2, 4, 16, 16
    Ch = 32  # hidden feature channels of the synthetic backbone

    key = jax.random.PRNGKey(0)
    k_img, k_w1, k_b1, k_w2, k_b2 = jax.random.split(key, 5)

    image = jax.random.normal(k_img, (N, Cin, H, W), dtype=jnp.float32)

    # Deterministic synthetic parameters (module's __init__ provides no
    # checkpoint; CreateModel backbone is replaced by a small conv stack).
    w1 = jax.random.normal(k_w1, (3, 3, Cin, Ch), dtype=jnp.float32) * 0.1
    b1 = jax.random.normal(k_b1, (Ch,), dtype=jnp.float32) * 0.01
    w2 = jax.random.normal(k_w2, (Ch, 1), dtype=jnp.float32) * 0.1
    b2 = jax.random.normal(k_b2, (1,), dtype=jnp.float32) * 0.01
    debias = jnp.float32(0.0)  # nn.Parameter(torch.tensor(0.0)) at init

    prob = dbmatch_forward(image, w1, b1, w2, b2, debias)
    jax.block_until_ready(prob)

    assert prob.shape == (N, 1, H, W)
    assert bool(jnp.all((prob >= 0.0) & (prob <= 1.0)))

    # Pure-JAX f32 reference of the same forward (conv3x3 + ReLU + 1x1 + sigmoid).
    x_nhwc = jnp.transpose(image, (0, 2, 3, 1))
    x_pad = jnp.pad(x_nhwc, ((0, 0), (1, 1), (1, 1), (0, 0)))
    acc = jnp.zeros((N, H, W, Ch), jnp.float32)
    for dy in range(3):
        for dx in range(3):
            acc = acc + jnp.einsum("nhwc,cf->nhwf",
                                   x_pad[:, dy:dy + H, dx:dx + W, :],
                                   w1[dy, dx])
    feat_ref = jnp.maximum(acc + b1, 0.0)
    logit_ref = jnp.einsum("nhwc,co->nhwo", feat_ref, w2) + b2 - debias
    prob_ref = jnp.transpose(jax.nn.sigmoid(logit_ref), (0, 3, 1, 2))
    assert float(jnp.max(jnp.abs(prob - prob_ref))) < 2e-2  # bf16 conv inputs

    # TODO(synk): update()/training path (AdamW, BCE losses, EMA bias update,
    # metric accumulation) is stateful training logic, not part of forward().
    print("KERNEL_OK")
</pallas_src>

<mosaic_0001>
module attributes {stable_mosaic.version = 11 : i64} {
  func.func @dbmatch_kernel(%arg0: i32, %arg1: i32, %arg2: memref<1x1x4x2432xbf16, #tpu.memory_space<vmem>>, %arg3: memref<9x32x4xbf16, #tpu.memory_space<vmem>>, %arg4: memref<32x1xf32, #tpu.memory_space<vmem>>, %arg5: memref<32x1xf32, #tpu.memory_space<vmem>>, %arg6: memref<1x1xf32, #tpu.memory_space<smem>>, %arg7: memref<1x1x1x2048xf32, #tpu.memory_space<vmem>>) attributes {dimension_semantics = [#tpu.dimension_semantics<parallel>, #tpu.dimension_semantics<parallel>], iteration_bounds = array<i64: 2, 1>, scalar_prefetch = 0 : i64, scratch_operands = 0 : i64, tpu.core_type = #tpu.core_type<tc>, window_params = [{transform_indices = @transform_0, window_bounds = array<i64: 1, 1, 4, 2432>}, {pipeline_mode = #tpu.pipeline_mode<synchronous>, transform_indices = @transform_1, window_bounds = array<i64: 9, 32, 4>}, {pipeline_mode = #tpu.pipeline_mode<synchronous>, transform_indices = @transform_2, window_bounds = array<i64: 32, 1>}, {pipeline_mode = #tpu.pipeline_mode<synchronous>, transform_indices = @transform_3, window_bounds = array<i64: 32, 1>}, {transform_indices = @transform_4, window_bounds = array<i64: 1, 1>}, {transform_indices = @transform_5, window_bounds = array<i64: 1, 1, 1, 2048>}]} {
    %c0 = arith.constant 0 : index
    %c0_0 = arith.constant 0 : index
    %c0_1 = arith.constant 0 : index
    %0 = vector.load %arg3[%c0, %c0_0, %c0_1] : memref<9x32x4xbf16, #tpu.memory_space<vmem>>, vector<1x32x4xbf16>
    %1 = vector.shape_cast %0 : vector<1x32x4xbf16> to vector<32x4xbf16>
    %c1 = arith.constant 1 : index
    %c0_2 = arith.constant 0 : index
    %c0_3 = arith.constant 0 : index
    %2 = vector.load %arg3[%c1, %c0_2, %c0_3] : memref<9x32x4xbf16, #tpu.memory_space<vmem>>, vector<1x32x4xbf16>
    %3 = vector.shape_cast %2 : vector<1x32x4xbf16> to vector<32x4xbf16>
    %c2 = arith.constant 2 : index
    %c0_4 = arith.constant 0 : index
    %c0_5 = arith.constant 0 : index
    %4 = vector.load %arg3[%c2, %c0_4, %c0_5] : memref<9x32x4xbf16, #tpu.memory_space<vmem>>, vector<1x32x4xbf16>
    %5 = vector.shape_cast %4 : vector<1x32x4xbf16> to vector<32x4xbf16>
    %c3 = arith.constant 3 : index
    %c0_6 = arith.constant 0 : index
    %c0_7 = arith.constant 0 : index
    %6 = vector.load %arg3[%c3, %c0_6, %c0_7] : memref<9x32x4xbf16, #tpu.memory_space<vmem>>, vector<1x32x4xbf16>
    %7 = vector.shape_cast %6 : vector<1x32x4xbf16> to vector<32x4xbf16>
    %c4 = arith.constant 4 : index
    %c0_8 = arith.constant 0 : index
    %c0_9 = arith.constant 0 : index
    %8 = vector.load %arg3[%c4, %c0_8, %c0_9] : memref<9x32x4xbf16, #tpu.memory_space<vmem>>, vector<1x32x4xbf16>
    %9 = vector.shape_cast %8 : vector<1x32x4xbf16> to vector<32x4xbf16>
    %c5 = arith.constant 5 : index
    %c0_10 = arith.constant 0 : index
    %c0_11 = arith.constant 0 : index
    %10 = vector.load %arg3[%c5, %c0_10, %c0_11] : memref<9x32x4xbf16, #tpu.memory_space<vmem>>, vector<1x32x4xbf16>
    %11 = vector.shape_cast %10 : vector<1x32x4xbf16> to vector<32x4xbf16>
    %c6 = arith.constant 6 : index
    %c0_12 = arith.constant 0 : index
    %c0_13 = arith.constant 0 : index
    %12 = vector.load %arg3[%c6, %c0_12, %c0_13] : memref<9x32x4xbf16, #tpu.memory_space<vmem>>, vector<1x32x4xbf16>
    %13 = vector.shape_cast %12 : vector<1x32x4xbf16> to vector<32x4xbf16>
    %c7 = arith.constant 7 : index
    %c0_14 = arith.constant 0 : index
    %c0_15 = arith.constant 0 : index
    %14 = vector.load %arg3[%c7, %c0_14, %c0_15] : memref<9x32x4xbf16, #tpu.memory_space<vmem>>, vector<1x32x4xbf16>
    %15 = vector.shape_cast %14 : vector<1x32x4xbf16> to vector<32x4xbf16>
    %c8 = arith.constant 8 : index
    %c0_16 = arith.constant 0 : index
    %c0_17 = arith.constant 0 : index
    %16 = vector.load %arg3[%c8, %c0_16, %c0_17] : memref<9x32x4xbf16, #tpu.memory_space<vmem>>, vector<1x32x4xbf16>
    %17 = vector.shape_cast %16 : vector<1x32x4xbf16> to vector<32x4xbf16>
    %c0_18 = arith.constant 0 : index
    %c0_19 = arith.constant 0 : index
    %18 = vector.load %arg4[%c0_18, %c0_19] : memref<32x1xf32, #tpu.memory_space<vmem>>, vector<32x1xf32>
    %c0_20 = arith.constant 0 : index
    %c0_21 = arith.constant 0 : index
    %19 = vector.load %arg5[%c0_20, %c0_21] : memref<32x1xf32, #tpu.memory_space<vmem>>, vector<32x1xf32>
    %c0_22 = arith.constant 0 : index
    %c0_23 = arith.constant 0 : index
    %20 = memref.load %arg6[%c0_22, %c0_23] : memref<1x1xf32, #tpu.memory_space<smem>>
    %c0_i32 = arith.constant 0 : i32
    %c4_i32 = arith.constant 4 : i32
    %21 = arith.addi %c0_i32, %c4_i32 : i32
    %c1_i32 = arith.constant 1 : i32
    scf.for %arg8 = %c0_i32 to %21 step %c1_i32  : i32 {
      %c1_i32_25 = arith.constant 1 : i32
      %22 = arith.muli %arg8, %c1_i32_25 : i32
      %c0_i32_26 = arith.constant 0 : i32
      %23 = arith.addi %c0_i32_26, %22 : i32
      %c512_i32 = arith.constant 512 : i32
      %24 = arith.muli %23, %c512_i32 : i32
      %25 = tpu.assume_multiple %24, 128 : i32
      %c0_i32_27 = arith.constant 0 : i32
      %26 = arith.addi %25, %c0_i32_27 : i32
      %27 = tpu.assume_multiple %26, 128 : i32
      %c0_28 = arith.constant 0 : index
      %c0_29 = arith.constant 0 : index
      %c0_30 = arith.constant 0 : index
      %28 = arith.index_cast %27 : i32 to index
      %29 = vector.load %arg2[%c0_28, %c0_29, %c0_30, %28] : memref<1x1x4x2432xbf16, #tpu.memory_space<vmem>>, vector<1x1x4x640xbf16>
      %30 = vector.shape_cast %29 : vector<1x1x4x640xbf16> to vector<4x640xbf16>
      %31 = vector.extract_strided_slice %30 {offsets = [0, 0], sizes = [4, 512], strides = [1, 1]} : vector<4x640xbf16> to vector<4x512xbf16>
      %cst = arith.constant dense<0.000000e+00> : vector<32x512xf32>
      %32 = tpu.matmul %1, %31, %cst {dimension_numbers = #tpu.dot_dimension_numbers<[1], [0], [0], [1], [0, 0, 1, 1], [], []>} : vector<32x4xbf16>, vector<4x512xbf16>, vector<32x512xf32> -> vector<32x512xf32>
      %33 = vector.extract_strided_slice %30 {offsets = [0, 1], sizes = [4, 512], strides = [1, 1]} : vector<4x640xbf16> to vector<4x512xbf16>
      %cst_31 = arith.constant dense<0.000000e+00> : vector<32x512xf32>
      %34 = tpu.matmul %3, %33, %cst_31 {dimension_numbers = #tpu.dot_dimension_numbers<[1], [0], [0], [1], [0, 0, 1, 1], [], []>} : vector<32x4xbf16>, vector<4x512xbf16>, vector<32x512xf32> -> vector<32x512xf32>
      %35 = arith.addf %32, %34 : vector<32x512xf32>
      %36 = vector.extract_strided_slice %30 {offsets = [0, 2], sizes = [4, 512], strides = [1, 1]} : vector<4x640xbf16> to vector<4x512xbf16>
      %cst_32 = arith.constant dense<0.000000e+00> : vector<32x512xf32>
      %37 = tpu.matmul %5, %36, %cst_32 {dimension_numbers = #tpu.dot_dimension_numbers<[1], [0], [0], [1], [0, 0, 1, 1], [], []>} : vector<32x4xbf16>, vector<4x512xbf16>, vector<32x512xf32> -> vector<32x512xf32>
      %38 = arith.addf %35, %37 : vector<32x512xf32>
      %c128_i32 = arith.constant 128 : i32
      %39 = arith.addi %25, %c128_i32 : i32
      %40 = tpu.assume_multiple %39, 128 : i32
      %c0_33 = arith.constant 0 : index
      %c0_34 = arith.constant 0 : index
      %c0_35 = arith.constant 0 : index
      %41 = arith.index_cast %40 : i32 to index
      %42 = vector.load %arg2[%c0_33, %c0_34, %c0_35, %41] : memref<1x1x4x2432xbf16, #tpu.memory_space<vmem>>, vector<1x1x4x640xbf16>
      %43 = vector.shape_cast %42 : vector<1x1x4x640xbf16> to vector<4x640xbf16>
      %44 = vector.extract_strided_slice %43 {offsets = [0, 0], sizes = [4, 512], strides = [1, 1]} : vector<4x640xbf16> to vector<4x512xbf16>
      %cst_36 = arith.constant dense<0.000000e+00> : vector<32x512xf32>
      %45 = tpu.matmul %7, %44, %cst_36 {dimension_numbers = #tpu.dot_dimension_numbers<[1], [0], [0], [1], [0, 0, 1, 1], [], []>} : vector<32x4xbf16>, vector<4x512xbf16>, vector<32x512xf32> -> vector<32x512xf32>
      %46 = arith.addf %38, %45 : vector<32x512xf32>
      %47 = vector.extract_strided_slice %43 {offsets = [0, 1], sizes = [4, 512], strides = [1, 1]} : vector<4x640xbf16> to vector<4x512xbf16>
      %cst_37 = arith.constant dense<0.000000e+00> : vector<32x512xf32>
      %48 = tpu.matmul %9, %47, %cst_37 {dimension_numbers = #tpu.dot_dimension_numbers<[1], [0], [0], [1], [0, 0, 1, 1], [], []>} : vector<32x4xbf16>, vector<4x512xbf16>, vector<32x512xf32> -> vector<32x512xf32>
      %49 = arith.addf %46, %48 : vector<32x512xf32>
      %50 = vector.extract_strided_slice %43 {offsets = [0, 2], sizes = [4, 512], strides = [1, 1]} : vector<4x640xbf16> to vector<4x512xbf16>
      %cst_38 = arith.constant dense<0.000000e+00> : vector<32x512xf32>
      %51 = tpu.matmul %11, %50, %cst_38 {dimension_numbers = #tpu.dot_dimension_numbers<[1], [0], [0], [1], [0, 0, 1, 1], [], []>} : vector<32x4xbf16>, vector<4x512xbf16>, vector<32x512xf32> -> vector<32x512xf32>
      %52 = arith.addf %49, %51 : vector<32x512xf32>
      %c256_i32 = arith.constant 256 : i32
      %53 = arith.addi %25, %c256_i32 : i32
      %54 = tpu.assume_multiple %53, 128 : i32
      %c0_39 = arith.constant 0 : index
      %c0_40 = arith.constant 0 : index
      %c0_41 = arith.constant 0 : index
      %55 = arith.index_cast %54 : i32 to index
      %56 = vector.load %arg2[%c0_39, %c0_40, %c0_41, %55] : memref<1x1x4x2432xbf16, #tpu.memory_space<vmem>>, vector<1x1x4x640xbf16>
      %57 = vector.shape_cast %56 : vector<1x1x4x640xbf16> to vector<4x640xbf16>
      %58 = vector.extract_strided_slice %57 {offsets = [0, 0], sizes = [4, 512], strides = [1, 1]} : vector<4x640xbf16> to vector<4x512xbf16>
      %cst_42 = arith.constant dense<0.000000e+00> : vector<32x512xf32>
      %59 = tpu.matmul %13, %58, %cst_42 {dimension_numbers = #tpu.dot_dimension_numbers<[1], [0], [0], [1], [0, 0, 1, 1], [], []>} : vector<32x4xbf16>, vector<4x512xbf16>, vector<32x512xf32> -> vector<32x512xf32>
      %60 = arith.addf %52, %59 : vector<32x512xf32>
      %61 = vector.extract_strided_slice %57 {offsets = [0, 1], sizes = [4, 512], strides = [1, 1]} : vector<4x640xbf16> to vector<4x512xbf16>
      %cst_43 = arith.constant dense<0.000000e+00> : vector<32x512xf32>
      %62 = tpu.matmul %15, %61, %cst_43 {dimension_numbers = #tpu.dot_dimension_numbers<[1], [0], [0], [1], [0, 0, 1, 1], [], []>} : vector<32x4xbf16>, vector<4x512xbf16>, vector<32x512xf32> -> vector<32x512xf32>
      %63 = arith.addf %60, %62 : vector<32x512xf32>
      %64 = vector.extract_strided_slice %57 {offsets = [0, 2], sizes = [4, 512], strides = [1, 1]} : vector<4x640xbf16> to vector<4x512xbf16>
      %cst_44 = arith.constant dense<0.000000e+00> : vector<32x512xf32>
      %65 = tpu.matmul %17, %64, %cst_44 {dimension_numbers = #tpu.dot_dimension_numbers<[1], [0], [0], [1], [0, 0, 1, 1], [], []>} : vector<32x4xbf16>, vector<4x512xbf16>, vector<32x512xf32> -> vector<32x512xf32>
      %66 = arith.addf %63, %65 : vector<32x512xf32>
      %67 = vector.broadcast %18 : vector<32x1xf32> to vector<32x512xf32>
      %68 = arith.addf %66, %67 : vector<32x512xf32>
      %cst_45 = arith.constant 0.000000e+00 : f32
      %69 = vector.broadcast %cst_45 : f32 to vector<32x512xf32>
      %70 = arith.maximumf %68, %69 : vector<32x512xf32>
      %71 = vector.broadcast %19 : vector<32x1xf32> to vector<32x512xf32>
      %72 = arith.mulf %70, %71 : vector<32x512xf32>
      %cst_46 = arith.constant dense<0.000000e+00> : vector<512xf32>
      %73 = vector.multi_reduction <add>, %72, %cst_46 [0] : vector<32x512xf32> to vector<512xf32>
      %74 = vector.shape_cast %73 : vector<512xf32> to vector<1x512xf32>
      %75 = vector.broadcast %20 : f32 to vector<1x512xf32>
      %76 = arith.addf %74, %75 : vector<1x512xf32>
      %77 = arith.negf %76 : vector<1x512xf32>
      %78 = math.exp %77 : vector<1x512xf32>
      %cst_47 = arith.constant 1.000000e+00 : f32
      %79 = vector.broadcast %cst_47 : f32 to vector<1x512xf32>
      %80 = arith.addf %79, %78 : vector<1x512xf32>
      %81 = arith.divf %79, %80 : vector<1x512xf32>
      %c0_48 = arith.constant 0 : index
      %c0_49 = arith.constant 0 : index
      %c0_50 = arith.constant 0 : index
      %82 = arith.index_cast %25 : i32 to index
      %83 = vector.load %arg7[%c0_48, %c0_49, %c0_50, %82] : memref<1x1x1x2048xf32, #tpu.memory_space<vmem>>, vector<1x1x1x512xf32>
      %84 = vector.shape_cast %83 : vector<1x1x1x512xf32> to vector<1x512xf32>
      %85 = vector.shape_cast %81 : vector<1x512xf32> to vector<1x1x1x512xf32>
      tpu.vector_store %arg7[%c0_48, %c0_49, %c0_50, %82], %85 {strides = array<i32>} : memref<1x1x1x2048xf32, #tpu.memory_space<vmem>>, vector<1x1x1x512xf32>,
    }
    %c4_i32_24 = arith.constant 4 : i32
    return
  }
  func.func @transform_0(%arg0: i32, %arg1: i32) -> (i32, i32, i32, i32) {
    %c0_i32 = arith.constant 0 : i32
    %c0_i32_0 = arith.constant 0 : i32
    %c0_i32_1 = arith.constant 0 : i32
    return %arg0, %arg1, %c0_i32, %c0_i32_0 : i32, i32, i32, i32
  }
  func.func @transform_1(%arg0: i32, %arg1: i32) -> (i32, i32, i32) {
    %c0_i32 = arith.constant 0 : i32
    %c0_i32_0 = arith.constant 0 : i32
    %c0_i32_1 = arith.constant 0 : i32
    %c0_i32_2 = arith.constant 0 : i32
    return %c0_i32, %c0_i32_0, %c0_i32_1 : i32, i32, i32
  }
  func.func @transform_2(%arg0: i32, %arg1: i32) -> (i32, i32) {
    %c0_i32 = arith.constant 0 : i32
    %c0_i32_0 = arith.constant 0 : i32
    %c0_i32_1 = arith.constant 0 : i32
    return %c0_i32, %c0_i32_0 : i32, i32
  }
  func.func @transform_3(%arg0: i32, %arg1: i32) -> (i32, i32) {
    %c0_i32 = arith.constant 0 : i32
    %c0_i32_0 = arith.constant 0 : i32
    %c0_i32_1 = arith.constant 0 : i32
    return %c0_i32, %c0_i32_0 : i32, i32
  }
  func.func @transform_4(%arg0: i32, %arg1: i32) -> (i32, i32) {
    %c0_i32 = arith.constant 0 : i32
    %c0_i32_0 = arith.constant 0 : i32
    %c0_i32_1 = arith.constant 0 : i32
    return %c0_i32, %c0_i32_0 : i32, i32
  }
  func.func @transform_5(%arg0: i32, %arg1: i32) -> (i32, i32, i32, i32) {
    %c0_i32 = arith.constant 0 : i32
    %c0_i32_0 = arith.constant 0 : i32
    %c0_i32_1 = arith.constant 0 : i32
    return %arg0, %arg1, %c0_i32, %c0_i32_0 : i32, i32, i32, i32
  }
}

</mosaic_0001>

<bundles_post_ra>
// kernel: tpu_custom_call.1
= control target key start
LH: loop header
LB: loop body
LE: loop exit
PB: predicated region body
PF: predicated region fallthrough
CT: control target
= control target key end

     0   :  { %s3243_s0 = inlined_call_operand.vmem [shape: bf16[2,1,4,2432], index: 0, kind: input, shape index: {}]   ;;  %s3244_s1 = inlined_call_operand.vmem [shape: bf16[9,32,4], index: 1, kind: input, shape index: {}]   ;;  %s3245_s2 = inlined_call_operand.vmem [shape: f32[32,1], index: 2, kind: input, shape index: {}]   ;;  %s3246_s3 = inlined_call_operand.vmem [shape: f32[32,1], index: 3, kind: input, shape index: {}]   ;;  %s3247_s4 = inlined_call_operand.<no memory space> [shape: f32[1,1], index: 4, kind: input, shape index: {}]   ;;  %s3248_s5 = inlined_call_operand.hbm [shape: f32[2,1,1,2048], index: 5, kind: output, shape index: {}]  }
   0x1   :  { %10 = sst [smem:[#allocation2]] %s3247_s4 }
   0x2   :  { %11 = vsyncpa [#allocation4], 0 }
   0x3   :  { %13 = vsyncpa [#allocation4 + $0x1], 0  ;;  %s2588_s20 = smov 0   ;;  %s2590_s21 = smov 0  }
   0x4   :  { %s2592_s22 = smov 0   ;;  %s2594_s23 = smov 0  }
   0x5   :  { %s2596_s24 = smov 0   ;;  %s2598_s25 = smov 0  }
   0x6 LB: > { %s2115_s4 = sadd.s32 4294967295, %s2543_s25   ;;  %s2116_s26 = sadd.s32 4294967294, %s2543_s25   ;;  %s2543_s25 = sphi %s2598_s25, %s19_s25   ;;  %s2539_s24 = sphi %s2596_s24, %s3288_s24   ;;  %s2535_s23 = sphi %s2594_s23, %s3287_s23   ;;  %s2531_s22 = sphi %s2592_s22, %s3286_s22   ;;  %s2527_s21 = sphi %s2590_s21, %s3285_s21   ;;  %s2523_s20 = sphi %s2588_s20, %s3284_s20  }
   0x7   : > { %s31_s27 = sadd.s32 1, %s2539_s24  ;;  %s152_s28 = sadd.s32 1, %s2531_s22 }
   0x8   : > { %p33_p0 = scmp.ge.s32.totalorder %s31_s27, 2  ;;  %p162_p1 = scmp.ne.s32.totalorder %s2531_s22, %s2527_s21 }
   0x9   : > { %p163_p2 = scmp.eq.s32.totalorder %s2115_s4, 1  ;;  %p168_p3 = scmp.ne.s32.totalorder %s2527_s21, %s2523_s20 }
   0xa   : > { %s3290_s27 = smov (%p33_p0, %s31_s27), 0  ;;  %p169_p5 = scmp.eq.s32.totalorder %s2116_s26, 1 }
   0xb   : > { %p2628_p4 = por %p163_p2, %p162_p1  ;;  %s147_s30 = ssub.s32 %s2539_s24, %s3290_s27 }
   0xc   : > { %p2119_p6 = scmp.ge.s32.totalorder %s2543_s25, 1  ;;  %p150_p7 = scmp.eq.s32.totalorder %s147_s30, 0 }
   0xd   : > { %p2635_p8 = por %p169_p5, %p168_p3  ;;  %p211_p9 = scmp.lt.s32.totalorder %s2543_s25, 3 }
   0xe   : > { %s2641_s7 = scalar_select %p150_p7, %s2531_s22, %s152_s28  }
   0xf   : > { %p212_p10 = pnand %p2119_p6, %p211_p9 }
  0x11   : > { %215 = sbr.rel (%p212_p10) target bundleno = 600 (0x258), region = 40 }
  0x18   : > { %s240_s8 = sand.u32 1, %s2527_s21   ;;  %p243_p11 = scmp.lt.s32.totalorder %s2535_s23, 1  ;;  %v2648_v0 = vld [vmem:[%s3244_s1] sm:$0xf]  ;;  %v2653_v1 = vld [vmem:[%s3244_s1 + $0x4] sm:$0xf] }
  0x19   : > { %3254 = vst [vmem:[#allocation6_spill] sm:$0xff] %v2648_v0  ;;  %3255 = vst [vmem:[#allocation7_spill] sm:$0xff] %v2653_v1  ;;  %s2657_s13 = sshll.u32 %s240_s8, 4  ;;  %v2662_v2 = vld [vmem:[%s3244_s1 + $0x8] sm:$0xf]  ;;  %v2672_v4 = vld [vmem:[%s3245_s2] sm:$0xff] }
  0x1a   : > { %3256 = vst [vmem:[#allocation8_spill] sm:$0xff] %v2662_v2  ;;  %v2667_v3 = vld [vmem:[%s3244_s1 + $0xc] sm:$0xf]  ;;  %3258 = vst [vmem:[#allocation10_spill] sm:$0xff] %v2672_v4  ;;  %v2677_v5 = vld [vmem:[%s3244_s1 + $0x10] sm:$0xf] }
  0x1b   : > { %3257 = vst [vmem:[#allocation9_spill] sm:$0xff] %v2667_v3  ;;  %3259 = vst [vmem:[#allocation11_spill] sm:$0xff] %v2677_v5  ;;  %v2682_v6 = vld [vmem:[%s3244_s1 + $0x14] sm:$0xf]  ;;  %v2687_v7 = vld [vmem:[%s3245_s2 + $0x8] sm:$0xff]  ;;  %s244_s11 = scalar_select %p243_p11, %s2535_s23, 1 }
  0x1c   : > { %3260 = vst [vmem:[#allocation12_spill] sm:$0xff] %v2682_v6  ;;  %3261 = vst [vmem:[#allocation13_spill] sm:$0xff] %v2687_v7  ;;  %v2693_v8 = vld [vmem:[%s3244_s1 + $0x18] sm:$0xf]  ;;  %v2698_v9 = vld [vmem:[%s3244_s1 + $0x1c] sm:$0xf] }
  0x1d   : > { %3262 = vst [vmem:[#allocation14_spill] sm:$0xff] %v2693_v8  ;;  %3263 = vst [vmem:[#allocation15_spill] sm:$0xff] %v2698_v9  ;;  %v2703_v10 = vld [vmem:[%s3245_s2 + $0x10] sm:$0xff]  ;;  %v2708_v11 = vld [vmem:[%s3244_s1 + $0x20] sm:$0xf]  ;;  %s2371_s10 = smul.u32 38, %s244_s11 }
  0x1e   : > { %3264 = vst [vmem:[#allocation16_spill] sm:$0xff] %v2703_v10  ;;  %3265 = vst [vmem:[#allocation17_spill] sm:$0xff] %v2708_v11  ;;  %v2713_v12 = vld [vmem:[%s3244_s1 + $0x24] sm:$0xf]  ;;  %v2718_v13 = vld [vmem:[%s3244_s1 + $0x28] sm:$0xf] }
  0x1f   : > { %3266 = vst [vmem:[#allocation18_spill] sm:$0xff] %v2713_v12  ;;  %v2723_v14 = vld [vmem:[%s3244_s1 + $0x2c] sm:$0xf]  ;;  %v2728_v15 = vld [vmem:[%s3244_s1 + $0x30] sm:$0xf]  ;;  %v2733_v16 = vld [vmem:[%s3245_s2 + $0x18] sm:$0xff]  ;;  %s2753_s14 = scalar_lea.vmem %s3243_s0, %s2371_s10 }
  0x20   : > { %3267 = vst [vmem:[#allocation19_spill] sm:$0xff] %v2733_v16  ;;  %v2738_v17 = vld [vmem:[%s3244_s1 + $0x34] sm:$0xf]  ;;  %v2743_v18 = vld [vmem:[%s3244_s1 + $0x38] sm:$0xf]  ;;  %v2858_v40 = vld [vmem:[%s3246_s3] sm:$0xff] }
  0x21   : > { %v2748_v19 = vld [vmem:[%s3244_s1 + $0x3c] sm:$0xf]  ;;  %v2758_v20 = vld [vmem:[%s3244_s1 + $0x40] sm:$0xf]  ;;  %v2763_v21 = vld [vmem:[%s3244_s1 + $0x44] sm:$0xf] }
  0x22   : > { %v2768_v22 = vld [vmem:[%s3244_s1 + $0x48] sm:$0xf]  ;;  %v2773_v23 = vld [vmem:[%s3244_s1 + $0x4c] sm:$0xf]  ;;  %v2778_v24 = vld [vmem:[%s3244_s1 + $0x50] sm:$0xf] }
  0x23   : > { %v2783_v25 = vld [vmem:[%s3244_s1 + $0x54] sm:$0xf]  ;;  %v2788_v26 = vld [vmem:[%s3244_s1 + $0x58] sm:$0xf]  ;;  %v2793_v27 = vld [vmem:[%s3244_s1 + $0x5c] sm:$0xf] }
  0x24   : > { %v2798_v28 = vld [vmem:[%s3244_s1 + $0x60] sm:$0xf]  ;;  %v2803_v29 = vld [vmem:[%s3244_s1 + $0x64] sm:$0xf]  ;;  %v2808_v30 = vld [vmem:[%s3244_s1 + $0x68] sm:$0xf] }
  0x25   : > { %v2813_v31 = vld [vmem:[%s3244_s1 + $0x6c] sm:$0xf]  ;;  %v2818_v32 = vld [vmem:[%s3244_s1 + $0x70] sm:$0xf]  ;;  %v2823_v33 = vld [vmem:[%s3244_s1 + $0x74] sm:$0xf] }
  0x26   : > { %v2828_v34 = vld [vmem:[%s3244_s1 + $0x78] sm:$0xf]  ;;  %v2833_v35 = vld [vmem:[%s3244_s1 + $0x7c] sm:$0xf]  ;;  %v2838_v36 = vld [vmem:[%s3244_s1 + $0x80] sm:$0xf] }
  0x27   : > { %v2843_v37 = vld [vmem:[%s3244_s1 + $0x84] sm:$0xf]  ;;  %v2848_v38 = vld [vmem:[%s3244_s1 + $0x88] sm:$0xf]  ;;  %v2853_v39 = vld [vmem:[%s3244_s1 + $0x8c] sm:$0xf] }
  0x28   : > { %v2863_v41 = vld [vmem:[%s3246_s3 + $0x8] sm:$0xff]  ;;  %v2868_v42 = vld [vmem:[%s3246_s3 + $0x10] sm:$0xff]  ;;  %v2873_v43 = vld [vmem:[%s3246_s3 + $0x18] sm:$0xff]  ;;  %s2875_s28 = sld [smem:[#allocation2]]  ;;  %s242_s30 = scalar_lea.vmem [#allocation3], %s2657_s13 }
  0x29   : > { %s2878_s9 = smov 0  }
  0x2a LB: >> { %v3249_v44 = vlaneseq  ;;  %v2549_v45 = vmov 1983009808   ;;  %s2884_s12 = sshll.u32 %s2547_s9, 9  ;;  %v3250_v49 = vmov 0   ;;  %s2551_s18 = smov 127   ;;  %v3268_v4 = vld [vmem:[#allocation10_spill] sm:$0xff]  ;;  %s2547_s9 = sphi %s2878_s9, %s311_s9  }
  0x2b   : >> { %v333_v46 = vunpack.c.l.s4 %v2549_v45  ;;  %s313_s15 = sshra.s32 %s2884_s12, 7  ;;  %422 = vmatprep.mubr.bf16.mxu0 %v3250_v49  ;;  %475 = vmatprep.mubr.bf16.mxu1 %v3250_v49  ;;  %s795_s19 = sadd.s32 128, %s2884_s12  ;;  %v3269_v7 = vld [vmem:[#allocation13_spill] sm:$0xff]  ;;  %v3270_v16 = vld [vmem:[#allocation19_spill] sm:$0xff]  ;;  %v3271_v10 = vld [vmem:[#allocation16_spill] sm:$0xff]  ;;  %vm365_vm0 = vcmask 1039360  }
  0x2c   : >> { %v2887_v47 = vshrl.u32 %v3249_v44, 7  ;;  %s2155_s16 = sshll.u32 %s313_s15, 1  ;;  %2441 = vset.pattern.permute.xlu1 %v3250_v49  ;;  %2440 = vset.pattern.permute.xlu0 %v3250_v49  ;;  %s796_s4 = sshra.s32 %s795_s19, 7  ;;  %vm377_vm1 = vcmask 1041408   ;;  %v3272_v6 = vld [vmem:[#allocation12_spill] sm:$0xff]  ;;  %v3273_v5 = vld [vmem:[#allocation11_spill] sm:$0xff] }
  0x2d   : >> { %v334_v48 = vunpack.c.0.s8 %v333_v46  ;;  %s316_s17 = scalar_lea.vmem %s2753_s14, %s2155_s16  ;;  %s2181_s11 = sshll.u32 %s796_s4, 1  ;;  %vm370_vm2 = vcmask 31744   ;;  %vm650_vm3 = vcmask 1031168   ;;  %v3275_v9 = vld [vmem:[#allocation15_spill] sm:$0xff]  ;;  %v3276_v8 = vld [vmem:[#allocation14_spill] sm:$0xff]  ;;  %v3279_v3 = vld [vmem:[#allocation9_spill] sm:$0xff] }
  0x2e   : >> { %v317_v51 = vld [vmem:[%s316_s17] sm:$0xff]  ;;  %v2158_v57 = vld.sshfl [vmem:[%s316_s17 + $0x8] sm:$0x3 pattern:$0x76325410]  ;;  %s2552_s26 = smov 126   ;;  %s799_s10 = scalar_lea.vmem %s2753_s14, %s2181_s11 }
  0x2f   : >> { %v337_v50 = vsub.s32 %v334_v48, %v2887_v47  ;;  %v331_v53 = vcombine.high %v317_v51, %v317_v51  ;;  %v800_v58 = vld [vmem:[%s799_s10] sm:$0xff]  ;;  %s1306_s16 = sadd.s32 256, %s2884_s12  ;;  %v2192_v45 = vld.sshfl [vmem:[%s799_s10 + $0x8] sm:$0x3 pattern:$0x76325410] }
  0x30   : >> { %v813_v60 = vcombine.high %v800_v58, %v800_v58  ;;  %s1307_s17 = sshra.s32 %s1306_s16, 7  ;;  %v3277_v1 = vld [vmem:[#allocation7_spill] sm:$0xff]  ;;  %v3278_v0 = vld [vmem:[#allocation6_spill] sm:$0xff]  ;;  %v3280_v2 = vld [vmem:[#allocation8_spill] sm:$0xff]  ;;  %s311_s9 = sadd.s32 1, %s2547_s9  }
  0x31   : >> { %v2898_v52 = vrot.slane %v317_v51, %v337_v50  ;;  %v2902_v54 = vrot.slane %v331_v53, %v337_v50  ;;  %v2929_v59 = vrot.slane %v800_v58, %v337_v50  ;;  %s2207_s19 = sshll.u32 %s1307_s17, 1  ;;  %v3281_v12 = vld [vmem:[#allocation18_spill] sm:$0xff]  ;;  %v3282_v11 = vld [vmem:[#allocation17_spill] sm:$0xff]  ;;  %p308_p12 = scmp.ge.s32.totalorder %s311_s9, 4  }
  0x32   : >> { %v2938_v62 = vrot.slane %v813_v60, %v337_v50  ;;  %s1310_s4 = scalar_lea.vmem %s2753_s14, %s2207_s19  ;;  %s2242_s11 = sshll.u32 (%p308_p12), %s2535_s23, 8 }
  0x33   : >> { %355 = vrot.lane.b32.xlu0 %v2898_v52, %s2551_s18  ;;  %v2906_v55 = vcombine.high %v2898_v52, %v2898_v52  ;;  %359 = vrot.lane.b32.xlu1 %v2902_v54, %s2551_s18  ;;  %v2913_v56 = vcombine.high %v2902_v54, %v2902_v54  ;;  %v2934_v61 = vcombine.high %v2929_v59, %v2929_v59  ;;  %v1311_v46 = vld [vmem:[%s1310_s4] sm:$0xff]  ;;  %v2218_v60 = vld.sshfl [vmem:[%s1310_s4 + $0x8] sm:$0x3 pattern:$0x76325410]  ;;  %s3198_s12 = scalar_lea.hbm (%p308_p12), %s3248_s5, %s2242_s11  ;;  %s2008_s16 = scalar_lea.sflag (%p308_p12), [#allocation4], %s240_s8 }
  0x34   : >> { %v2945_v63 = vcombine.high %v2938_v62, %v2938_v62  ;;  %v2961_v48 = vrot.slane %v1311_v46, %v337_v50  ;;  %v1324_v51 = vcombine.high %v1311_v46, %v1311_v46  ;;  %s2554_s14 = smov (%p308_p12), [#allocation3]  }
  0x36   : >> { %v2966_v53 = vcombine.high %v2961_v48, %v2961_v48 }
  0x37   : >> { %357 = vrot.lane.b32.xlu0 %v2906_v55, %s2551_s18  ;;  %361 = vrot.lane.b32.xlu1 %v2913_v56, %s2551_s18 }
  0x3b   : >> { %363 = vrot.lane.b32.xlu0 %v2158_v57, %s2551_s18  ;;  %640 = vrot.lane.b32.xlu1 %v2898_v52, %s2552_s26 }
  0x3f   : >> { %642 = vrot.lane.b32.xlu0 %v2906_v55, %s2552_s26  ;;  %644 = vrot.lane.b32.xlu1 %v2902_v54, %s2552_s26 }
  0x43   : >> { %646 = vrot.lane.b32.xlu0 %v2913_v56, %s2552_s26  ;;  %648 = vrot.lane.b32.xlu1 %v2158_v57, %s2552_s26  ;;  %v2970_v57 = vrot.slane %v1324_v51, %v337_v50 }
  0x45   : >> { %v2976_v58 = vcombine.high %v2970_v57, %v2970_v57 }
  0x47   : >> { %988 = vrot.lane.b32.xlu0 %v2929_v59, %s2551_s18  ;;  %990 = vrot.lane.b32.xlu1 %v2934_v61, %s2551_s18 }
  0x4b   : >> { %992 = vrot.lane.b32.xlu0 %v2938_v62, %s2551_s18  ;;  %994 = vrot.lane.b32.xlu1 %v2945_v63, %s2551_s18 }
  0x4f   : >> { %996 = vrot.lane.b32.xlu0 %v2192_v45, %s2551_s18  ;;  %1152 = vrot.lane.b32.xlu1 %v2929_v59, %s2552_s26 }
  0x53   : >> { %1154 = vrot.lane.b32.xlu0 %v2934_v61, %s2552_s26  ;;  %1156 = vrot.lane.b32.xlu1 %v2938_v62, %s2552_s26 }
  0x57   : >> { %1158 = vrot.lane.b32.xlu0 %v2945_v63, %s2552_s26  ;;  %1160 = vrot.lane.b32.xlu1 %v2192_v45, %s2552_s26 }
  0x5b   : >> { %1499 = vrot.lane.b32.xlu0 %v2961_v48, %s2551_s18  ;;  %1501 = vrot.lane.b32.xlu1 %v2966_v53, %s2551_s18 }
  0x5f   : >> { %1503 = vrot.lane.b32.xlu0 %v2970_v57, %s2551_s18  ;;  %1505 = vrot.lane.b32.xlu1 %v2976_v58, %s2551_s18 }
  0x63   : >> { %1507 = vrot.lane.b32.xlu0 %v2218_v60, %s2551_s18  ;;  %1663 = vrot.lane.b32.xlu1 %v2961_v48, %s2552_s26  ;;  %s2001_s18 = scalar_lea.vmem %s242_s30, %s313_s15 [#allocation3]  ;;  %s2024_s15 = sshll.u32 (%p308_p12), %s242_s30, 4  ;;  %s2025_s15 = int_to_ptr.vmem [resolvable:$true] %s2024_s15 }
  0x64   : > { %s2461_s17 = scalar_lea.vmem (%p308_p12), %s2025_s15, 256 }
  0x65   : > { %p2462_p13 = scmp.ne.s32.totalorder (%p308_p12), %s2025_s15, %s2461_s17 }
  0x67   : >> { %1665 = vrot.lane.b32.xlu0 %v2966_v53, %s2552_s26  ;;  %1667 = vrot.lane.b32.xlu1 %v2970_v57, %s2552_s26  ;;  %p2463_p0 = pnand (%p308_p12), %p2462_p13, %p2628_p4 }
  0x69   : > { %p2464_p1 = pneg (%p308_p12), %p2463_p0 }
  0x6b   : >> { %1669 = vrot.lane.b32.xlu0 %v2976_v58, %s2552_s26  ;;  %1671 = vrot.lane.b32.xlu1 %v2218_v60, %s2552_s26 }
  0x6f   : >> { %1819 = vperm.xlu0 %2440, %v3268_v4   ;;  %1824 = vperm.xlu1 %2441, %v3269_v7   ;;  %v2156_v4 = vcombine.low %v3273_v5, %v3272_v6 }
  0x73   : >> { %1834 = vperm.xlu0 %2440, %v3270_v16   ;;  %1829 = vperm.xlu1 %2441, %v3271_v10   ;;  %v513_v16 = vsel %vm377_vm1, %v2898_v52, 0 }
  0x77   : >> { %1876 = vperm.xlu0 %2440, %v2863_v41   ;;  %1871 = vperm.xlu1 %2441, %v2858_v40  }
  0x7b   : >> { %1886 = vperm.xlu0 %2440, %v2873_v43   ;;  %1881 = vperm.xlu1 %2441, %v2868_v42  }
  0xa5   : >> { %v356_v50 = vpop.permute.xlu0 %355  ;;  %v360_v45 = vpop.permute.xlu1 %359 }
  0xa9   : >> { %v358_v46 = vpop.permute.xlu0 %357  ;;  %v362_v44 = vpop.permute.xlu1 %361 }
  0xaa   : >> { %v367_v51 = vsel %vm365_vm0, %v358_v46, %v360_v45  ;;  %v366_v60 = vsel %vm365_vm0, %v356_v50, %v358_v46  ;;  %v368_v7 = vsel %vm365_vm0, %v360_v45, %v362_v44  ;;  %v2165_v45 = vcombine.low %v3278_v0, %v3277_v1 }
  0xab   : >> { %2159 = vmatprep.subr.msk.bf16.mxu0 %vm377_vm1, %v367_v51  ;;  %v379_v49 = vsel %vm377_vm1, %v366_v60, 0  ;;  %v385_v46 = vsel %vm377_vm1, %v368_v7, 0 }
  0xac   : >> { %391 = vmatpush1.bf16.msra.mxu0 %v379_v49  ;;  %v519_v49 = vsel %vm377_vm1, %v2902_v54, 0 }
  0xad   : >> { %v364_v10 = vpop.permute.xlu0 %363  ;;  %2167 = vmatprep.subr.msk.bf16.mxu0 %vm377_vm1, %v2906_v55  ;;  %v641_v51 = vpop.permute.xlu1 %640  ;;  %v3274_v55 = vmov 0  }
  0xae   : >> { %v369_v50 = vsel %vm365_vm0, %v362_v44, %v364_v10  ;;  %v2157_v10 = vcombine.low %v3276_v8, %v3275_v9 }
  0xaf   : >> { %2160 = vmatmul.mubr.msk.bf16.vlgmr.msra.gmra.mrb[0].mxu0 %vm370_vm2, %v2156_v4  ;;  %2162 = vmatprep.subr.msk.bf16.mxu1 %vm377_vm1, %v369_v50 }
  0xb0   : >> { %444 = vmatpush1.bf16.msra.mxu1 %v385_v46  ;;  %525 = vmatpush1.bf16.msra.mxu0 %v513_v16 }
  0xb1   : >> { %2170 = vmatprep.subr.msk.bf16.mxu1 %vm377_vm1, %v2913_v56  ;;  %432 = vmatprep.mubr.bf16.mxu0 %v3274_v55  ;;  %v643_v52 = vpop.permute.xlu0 %642  ;;  %v645_v44 = vpop.permute.xlu1 %644 }
  0xb2   : >> { %v652_v7 = vsel %vm650_vm3, %v643_v52, %v645_v44 }
  0xb3   : >> { %2163 = vmatmul.mubr.msk.bf16.vlgmr.msra.gmra.mrb[0].mxu1 %vm370_vm2, %v2156_v4  ;;  %2175 = vmatprep.subr.msk.bf16.mxu0 %vm377_vm1, %v652_v7  ;;  %v651_v4 = vsel %vm650_vm3, %v641_v51, %v643_v52  ;;  %v2166_v51 = vcombine.low %v3280_v2, %v3279_v3 }
  0xb4   : >> { %578 = vmatpush1.bf16.msra.mxu1 %v519_v49  ;;  %485 = vmatprep.mubr.bf16.mxu1 %v3274_v55  ;;  %v662_v60 = vsel %vm377_vm1, %v651_v4, 0 }
  0xb5   : >> { %v647_v16 = vpop.permute.xlu0 %646  ;;  %v649_v54 = vpop.permute.xlu1 %648 }
  0xb6   : >> { %v654_v56 = vsel %vm650_vm3, %v647_v16, %v649_v54  ;;  %v653_v50 = vsel %vm650_vm3, %v645_v44, %v647_v16  ;;  %v837_v44 = vsel %vm377_vm1, %v2929_v59, 0  ;;  %v843_v54 = vsel %vm377_vm1, %v2938_v62, 0 }
  0xb7   : >> { %2161 = vmatmul.mubr.msk.bf16.gmra.mrb[4].mxu0 %vm370_vm2, %v2157_v10  ;;  %2178 = vmatprep.subr.msk.bf16.mxu1 %vm377_vm1, %v654_v56  ;;  %v668_v46 = vsel %vm377_vm1, %v653_v50, 0  ;;  %v2174_v59 = vcombine.low %v2718_v13, %v2723_v14  ;;  %v2182_v50 = vcombine.low %v2728_v15, %v2738_v17 }
  0xb8   : >> { %556 = vmatprep.mubr.bf16.mxu0 %v3274_v55 }
  0xb9   : >> { %v989_v49 = vpop.permute.xlu0 %988  ;;  %v991_v52 = vpop.permute.xlu1 %990 }
  0xbb   : >> { %2164 = vmatmul.mubr.msk.bf16.gmra.mrb[4].mxu1 %vm370_vm2, %v2157_v10 }
  0xbc   : >> { %609 = vmatprep.mubr.bf16.mxu1 %v3274_v55 }
  0xbd   : >> { %v993_v10 = vpop.permute.xlu0 %992 }
  0xbe   : >> { %v999_v7 = vsel %vm365_vm0, %v991_v52, %v993_v10 }
  0xbf   : >> { %2168 = vmatmul.mubr.msk.bf16.vlgmr.msra.gmra.mrb[0].mxu0 %vm370_vm2, %v2165_v45 }
  0xc0   : >> { %674 = vmatpush1.bf16.msra.mxu0 %v662_v60  ;;  %566 = vmatprep.mubr.bf16.mxu0 %v3274_v55  ;;  %v998_v60 = vsel %vm365_vm0, %v989_v49, %v991_v52 }
  0xc1   : >> { %2184 = vmatprep.subr.msk.bf16.mxu0 %vm377_vm1, %v2934_v61  ;;  %v2173_v61 = vcombine.low %v3282_v11, %v3281_v12  ;;  %v997_v16 = vpop.permute.xlu0 %996 }
  0xc3   : >> { %2171 = vmatmul.mubr.msk.bf16.vlgmr.msra.gmra.mrb[0].mxu1 %vm370_vm2, %v2165_v45 }
  0xc4   : >> { %727 = vmatpush1.bf16.msra.mxu1 %v668_v46  ;;  %619 = vmatprep.mubr.bf16.mxu1 %v3274_v55  ;;  %v1009_v46 = vsel %vm377_vm1, %v998_v60, 0 }
  0xc5   : >> { %2187 = vmatprep.subr.msk.bf16.mxu1 %vm377_vm1, %v2945_v63  ;;  %v995_v63 = vpop.permute.xlu1 %994  ;;  %v1155_v62 = vpop.permute.xlu0 %1154 }
  0xc6   : >> { %v1001_v56 = vsel %vm365_vm0, %v995_v63, %v997_v16  ;;  %v2190_v16 = vcombine.low %v2758_v20, %v2763_v21 }
  0xc7   : >> { %2169 = vmatmul.mubr.msk.bf16.gmra.mrb[4].mxu0 %vm370_vm2, %v2166_v51 }
  0xc8   : >> { %705 = vmatprep.mubr.bf16.mxu0 %v3274_v55 }
  0xc9   : >> { %v1153_v4 = vpop.permute.xlu1 %1152 }
  0xcb   : >> { %2172 = vmatmul.mubr.msk.bf16.gmra.mrb[4].mxu1 %vm370_vm2, %v2166_v51  ;;  %v1000_v51 = vsel %vm365_vm0, %v993_v10, %v995_v63  ;;  %v2183_v10 = vcombine.low %v2743_v18, %v2748_v19  ;;  %v1162_v63 = vsel %vm650_vm3, %v1153_v4, %v1155_v62  ;;  %v2191_v4 = vcombine.low %v2768_v22, %v2773_v23 }
  0xcc   : >> { %758 = vmatprep.mubr.bf16.mxu1 %v3274_v55  ;;  %v1015_v49 = vsel %vm377_vm1, %v1000_v51, 0 }
  0xcd   : >> { %v1157_v45 = vpop.permute.xlu1 %1156 }
  0xcf   : >> { %2176 = vmatmul.mubr.msk.bf16.vlgmr.msra.gmra.mrb[0].mxu0 %vm370_vm2, %v2173_v61 }
  0xd0   : >> { %849 = vmatpush1.bf16.msra.mxu0 %v837_v44  ;;  %715 = vmatprep.mubr.bf16.mxu0 %v3274_v55  ;;  %v1159_v44 = vpop.permute.xlu0 %1158 }
  0xd1   : >> { %2193 = vmatprep.subr.msk.bf16.mxu0 %vm377_vm1, %v999_v7  ;;  %v1161_v7 = vpop.permute.xlu1 %1160 }
  0xd2   : >> { %v1165_v52 = vsel %vm650_vm3, %v1159_v44, %v1161_v7 }
  0xd3   : >> { %2179 = vmatmul.mubr.msk.bf16.vlgmr.msra.gmra.mrb[0].mxu1 %vm370_vm2, %v2173_v61  ;;  %v1163_v61 = vsel %vm650_vm3, %v1155_v62, %v1157_v45 }
  0xd4   : >> { %902 = vmatpush1.bf16.msra.mxu1 %v843_v54  ;;  %768 = vmatprep.mubr.bf16.mxu1 %v3274_v55  ;;  %v1173_v54 = vsel %vm377_vm1, %v1162_v63, 0  ;;  %v1500_v62 = vpop.permute.xlu0 %1499 }
  0xd5   : >> { %2196 = vmatprep.subr.msk.bf16.mxu1 %vm377_vm1, %v1001_v56  ;;  %v1164_v56 = vsel %vm650_vm3, %v1157_v45, %v1159_v44  ;;  %v1502_v45 = vpop.permute.xlu1 %1501 }
  0xd7   : >> { %2177 = vmatmul.mubr.msk.bf16.gmra.mrb[4].mxu0 %vm370_vm2, %v2174_v59 }
  0xd8   : >> { %880 = vmatprep.mubr.bf16.mxu0 %v3274_v55  ;;  %v1504_v60 = vpop.permute.xlu0 %1503 }
  0xdb   : >> { %2180 = vmatmul.mubr.msk.bf16.gmra.mrb[4].mxu1 %vm370_vm2, %v2174_v59  ;;  %v1179_v59 = vsel %vm377_vm1, %v1164_v56, 0 }
  0xdc   : >> { %933 = vmatprep.mubr.bf16.mxu1 %v3274_v55  ;;  %v1508_v51 = vpop.permute.xlu0 %1507 }
  0xdf   : >> { %2185 = vmatmul.mubr.msk.bf16.vlgmr.msra.gmra.mrb[0].mxu0 %vm370_vm2, %v2182_v50 }
  0xe0   : >> { %1021 = vmatpush1.bf16.msra.mxu0 %v1009_v46  ;;  %890 = vmatprep.mubr.bf16.mxu0 %v3274_v55  ;;  %v1510_v46 = vsel %vm365_vm0, %v1502_v45, %v1504_v60 }
  0xe1   : >> { %2201 = vmatprep.subr.msk.bf16.mxu0 %vm377_vm1, %v1163_v61  ;;  %v1354_v61 = vsel %vm377_vm1, %v2970_v57, 0  ;;  %v1666_v57 = vpop.permute.xlu0 %1665 }
  0xe3   : >> { %2188 = vmatmul.mubr.msk.bf16.vlgmr.msra.gmra.mrb[0].mxu1 %vm370_vm2, %v2182_v50  ;;  %v1348_v50 = vsel %vm377_vm1, %v2961_v48, 0  ;;  %v2200_v48 = vcombine.low %v2788_v26, %v2793_v27 }
  0xe4   : >> { %1074 = vmatpush1.bf16.msra.mxu1 %v1015_v49  ;;  %943 = vmatprep.mubr.bf16.mxu1 %v3274_v55 }
  0xe5   : >> { %2204 = vmatprep.subr.msk.bf16.mxu1 %vm377_vm1, %v1165_v52  ;;  %v1509_v52 = vsel %vm365_vm0, %v1500_v62, %v1502_v45  ;;  %v1670_v56 = vpop.permute.xlu0 %1669  ;;  %v2209_v45 = vcombine.low %v2808_v30, %v2813_v31 }
  0xe6   : >> { %v1520_v63 = vsel %vm377_vm1, %v1509_v52, 0 }
  0xe7   : >> { %2186 = vmatmul.mubr.msk.bf16.gmra.mrb[4].mxu0 %vm370_vm2, %v2183_v10 }
  0xe8   : >> { %1052 = vmatprep.mubr.bf16.mxu0 %v3274_v55 }
  0xeb   : >> { %2189 = vmatmul.mubr.msk.bf16.gmra.mrb[4].mxu1 %vm370_vm2, %v2183_v10  ;;  %v2208_v10 = vcombine.low %v2798_v28, %v2803_v29 }
  0xec   : >> { %1105 = vmatprep.mubr.bf16.mxu1 %v3274_v55 }
  0xef   : >> { %2194 = vmatmul.mubr.msk.bf16.vlgmr.msra.gmra.mrb[0].mxu0 %vm370_vm2, %v2190_v16 }
  0xf0   : >> { %1185 = vmatpush1.bf16.msra.mxu0 %v1173_v54  ;;  %1062 = vmatprep.mubr.bf16.mxu0 %v3274_v55 }
  0xf1   : >> { %2210 = vmatprep.subr.msk.bf16.mxu0 %vm377_vm1, %v2966_v53  ;;  %v2199_v53 = vcombine.low %v2778_v24, %v2783_v25 }
  0xf3   : >> { %2197 = vmatmul.mubr.msk.bf16.vlgmr.msra.gmra.mrb[0].mxu1 %vm370_vm2, %v2190_v16 }
  0xf4   : >> { %1238 = vmatpush1.bf16.msra.mxu1 %v1179_v59  ;;  %1115 = vmatprep.mubr.bf16.mxu1 %v3274_v55 }
  0xf5   : >> { %2213 = vmatprep.subr.msk.bf16.mxu1 %vm377_vm1, %v2976_v58  ;;  %v1506_v58 = vpop.permute.xlu1 %1505 }
  0xf6   : >> { %v1512_v44 = vsel %vm365_vm0, %v1506_v58, %v1508_v51  ;;  %v1511_v16 = vsel %vm365_vm0, %v1504_v60, %v1506_v58  ;;  %v2217_v51 = vcombine.low %v2828_v34, %v2833_v35 }
  0xf7   : >> { %2195 = vmatmul.mubr.msk.bf16.gmra.mrb[4].mxu0 %vm370_vm2, %v2191_v4 }
  0xf8   : >> { %1216 = vmatprep.mubr.bf16.mxu0 %v3274_v55 }
  0xf9   : >> { %v1664_v7 = vpop.permute.xlu1 %1663 }
  0xfa   : >> { %v1673_v60 = vsel %vm650_vm3, %v1664_v7, %v1666_v57  ;;  %v1820_v7 = vpop.permute.xlu0 %1819 }
  0xfb   : >> { %2198 = vmatmul.mubr.msk.bf16.gmra.mrb[4].mxu1 %vm370_vm2, %v2191_v4  ;;  %v1526_v4 = vsel %vm377_vm1, %v1511_v16, 0 }
  0xfc   : >> { %1269 = vmatprep.mubr.bf16.mxu1 %v3274_v55 }
  0xfd   : >> { %v1668_v49 = vpop.permute.xlu1 %1667 }
  0xfe   : >> { %v1674_v54 = vsel %vm650_vm3, %v1666_v57, %v1668_v49 }
  0xff   : >> { %2202 = vmatmul.mubr.msk.bf16.vlgmr.msra.gmra.mrb[0].mxu0 %vm370_vm2, %v2199_v53 }
 0x100   : >> { %1360 = vmatpush1.bf16.msra.mxu0 %v1348_v50  ;;  %1226 = vmatprep.mubr.bf16.mxu0 %v3274_v55  ;;  %v1684_v50 = vsel %vm377_vm1, %v1673_v60, 0 }
 0x101   : >> { %2219 = vmatprep.subr.msk.bf16.mxu0 %vm377_vm1, %v1510_v46  ;;  %v1672_v59 = vpop.permute.xlu1 %1671  ;;  %v1675_v46 = vsel %vm650_vm3, %v1668_v49, %v1670_v56  ;;  %v3178_v49 = vpop.permute.xlu0 %1834 }
 0x102   : >> { %v1676_v62 = vsel %vm650_vm3, %v1670_v56, %v1672_v59  ;;  %v1690_v58 = vsel %vm377_vm1, %v1675_v46, 0 }
 0x103   : >> { %2205 = vmatmul.mubr.msk.bf16.vlgmr.msra.gmra.mrb[0].mxu1 %vm370_vm2, %v2199_v53  ;;  %v2216_v53 = vcombine.low %v2818_v32, %v2823_v33 }
 0x104   : >> { %1413 = vmatpush1.bf16.msra.mxu1 %v1354_v61  ;;  %1279 = vmatprep.mubr.bf16.mxu1 %v3274_v55  ;;  %v2225_v61 = vcombine.low %v2838_v36, %v2843_v37 }
 0x105   : >> { %2222 = vmatprep.subr.msk.bf16.mxu1 %vm377_vm1, %v1512_v44  ;;  %v2226_v44 = vcombine.low %v2848_v38, %v2853_v39 }
 0x107   : >> { %2203 = vmatmul.mubr.msk.bf16.gmra.mrb[4].mxu0 %vm370_vm2, %v2200_v48 }
 0x108   : >> { %1391 = vmatprep.mubr.bf16.mxu0 %v3274_v55 }
 0x10b   : >> { %2206 = vmatmul.mubr.msk.bf16.gmra.mrb[4].mxu1 %vm370_vm2, %v2200_v48  ;;  %v1825_v48 = vpop.permute.xlu1 %1824 }
 0x10c   : >> { %1444 = vmatprep.mubr.bf16.mxu1 %v3274_v55 }
 0x10f   : >> { %2211 = vmatmul.mubr.msk.bf16.vlgmr.msra.gmra.mrb[0].mxu0 %vm370_vm2, %v2208_v10  ;;  %v1830_v57 = vpop.permute.xlu1 %1829 }
 0x110   : >> { %1532 = vmatpush1.bf16.msra.mxu0 %v1520_v63  ;;  %1401 = vmatprep.mubr.bf16.mxu0 %v3274_v55 }
 0x111   : >> { %2227 = vmatprep.subr.msk.bf16.mxu0 %vm377_vm1, %v1674_v54 }
 0x113   : >> { %2214 = vmatmul.mubr.msk.bf16.vlgmr.msra.gmra.mrb[0].mxu1 %vm370_vm2, %v2208_v10 }
 0x114   : >> { %1585 = vmatpush1.bf16.msra.mxu1 %v1526_v4  ;;  %1454 = vmatprep.mubr.bf16.mxu1 %v3274_v55 }
 0x115   : >> { %2230 = vmatprep.subr.msk.bf16.mxu1 %vm377_vm1, %v1676_v62 }
 0x117   : >> { %2212 = vmatmul.mubr.msk.bf16.gmra.mrb[4].mxu0 %vm370_vm2, %v2209_v45 }
 0x118   : >> { %1563 = vmatprep.mubr.bf16.mxu0 %v3274_v55 }
 0x11b   : >> { %2215 = vmatmul.mubr.msk.bf16.gmra.mrb[4].mxu1 %vm370_vm2, %v2209_v45 }
 0x11c   : >> { %1616 = vmatprep.mubr.bf16.mxu1 %v3274_v55 }
 0x11f   : >> { %2220 = vmatmul.mubr.msk.bf16.vlgmr.msra.gmra.mrb[0].mxu0 %vm370_vm2, %v2216_v53 }
 0x120   : >> { %1696 = vmatpush1.bf16.msra.mxu0 %v1684_v50  ;;  %1573 = vmatprep.mubr.bf16.mxu0 %v3274_v55 }
 0x123   : >> { %2223 = vmatmul.mubr.msk.bf16.vlgmr.msra.gmra.mrb[0].mxu1 %vm370_vm2, %v2216_v53  ;;  %v1872_v53 = vpop.permute.xlu1 %1871 }
 0x124   : >> { %1749 = vmatpush1.bf16.msra.mxu1 %v1690_v58  ;;  %1626 = vmatprep.mubr.bf16.mxu1 %v3274_v55 }
 0x127   : >> { %2221 = vmatmul.mubr.msk.bf16.gmra.mrb[4].mxu0 %vm370_vm2, %v2217_v51 }
 0x128   : >> { %1727 = vmatprep.mubr.bf16.mxu0 %v3274_v55 }
 0x12b   : >> { %2224 = vmatmul.mubr.msk.bf16.gmra.mrb[4].mxu1 %vm370_vm2, %v2217_v51  ;;  %v1877_v51 = vpop.permute.xlu0 %1876 }
 0x12c   : >> { %1780 = vmatprep.mubr.bf16.mxu1 %v3274_v55 }
 0x12f   : >> { %2228 = vmatmul.mubr.msk.bf16.vlgmr.msra.gmra.mrb[0].mxu0 %vm370_vm2, %v2225_v61 }
 0x130   : >> { %1737 = vmatprep.mubr.bf16.mxu0 %v3274_v55 }
 0x133   : >> { %2231 = vmatmul.mubr.msk.bf16.vlgmr.msra.gmra.mrb[0].mxu1 %vm370_vm2, %v2225_v61 }
 0x134   : >> { %1790 = vmatprep.mubr.bf16.mxu1 %v3274_v55 }
 0x137   : >> { %2229 = vmatmul.mubr.msk.bf16.gmra.mrb[4].mxu0 %vm370_vm2, %v2226_v44 }
 0x13b   : >> { %2232 = vmatmul.mubr.msk.bf16.gmra.mrb[4].mxu1 %vm370_vm2, %v2226_v44 }
 0x202   : >> { %v1729_v52 = vpop.f32.mrb[0].mxu0 }
 0x203   : >> { %v1837_v10 = vadd.f32 %v1820_v7, %v1729_v52  ;;  %v1731_v63 = vpop.f32.mrb[1].mxu0 }
 0x204   : >> { %v1838_v16 = vadd.f32 %v1820_v7, %v1731_v63  ;;  %v1733_v54 = vpop.f32.mrb[2].mxu0 }
 0x205   : >> { %v1853_v56 = vmax.f32 %v1837_v10, 0.0  ;;  %v1841_v59 = vadd.f32 %v1825_v48, %v1733_v54  ;;  %v1735_v4 = vpop.f32.mrb[3].mxu0 }
 0x206   : >> { %v1854_v62 = vmax.f32 %v1838_v16, 0.0  ;;  %v1842_v45 = vadd.f32 %v1825_v48, %v1735_v4  ;;  %v1782_v55 = vpop.f32.mrb[0].mxu1 }
 0x207   : >> { %v1857_v60 = vmax.f32 %v1841_v59, 0.0  ;;  %v1839_v50 = vadd.f32 %v1820_v7, %v1782_v55  ;;  %v1784_v46 = vpop.f32.mrb[1].mxu1  ;;  %v1889_v0 = vmul.f32 %v1872_v53, %v1853_v56 }
 0x208   : >> { %v1858_v58 = vmax.f32 %v1842_v45, 0.0  ;;  %v1840_v61 = vadd.f32 %v1820_v7, %v1784_v46  ;;  %v1786_v44 = vpop.f32.mrb[2].mxu1  ;;  %v1890_v3 = vmul.f32 %v1872_v53, %v1854_v62  ;;  %v1882_v62 = vpop.permute.xlu1 %1881 }
 0x209   : >> { %v1893_v1 = vmul.f32 %v1877_v51, %v1857_v60  ;;  %v1855_v52 = vmax.f32 %v1839_v50, 0.0  ;;  %v1843_v2 = vadd.f32 %v1825_v48, %v1786_v44  ;;  %v1788_v63 = vpop.f32.mrb[3].mxu1 }
 0x20a   : >> { %v1894_v10 = vmul.f32 %v1877_v51, %v1858_v58  ;;  %v1856_v54 = vmax.f32 %v1840_v61, 0.0  ;;  %v1844_v5 = vadd.f32 %v1825_v48, %v1788_v63  ;;  %v1739_v16 = vpop.f32.mrb[4].mxu0 }
 0x20b   : >> { %v1859_v4 = vmax.f32 %v1843_v2, 0.0  ;;  %v1845_v6 = vadd.f32 %v1830_v57, %v1739_v16  ;;  %v1905_v59 = vadd.f32 %v1893_v1, %v1889_v0  ;;  %v1741_v8 = vpop.f32.mrb[5].mxu0  ;;  %v1891_v7 = vmul.f32 %v1872_v53, %v1855_v52 }
 0x20c   : >> { %v1860_v55 = vmax.f32 %v1844_v5, 0.0  ;;  %v1846_v9 = vadd.f32 %v1830_v57, %v1741_v8  ;;  %v1914_v45 = vadd.f32 %v1894_v10, %v1890_v3  ;;  %v1743_v11 = vpop.f32.mrb[6].mxu0  ;;  %v1892_v44 = vmul.f32 %v1872_v53, %v1856_v54  ;;  %v1887_v10 = vpop.permute.xlu0 %1886 }
 0x20d   : >> { %v1895_v46 = vmul.f32 %v1877_v51, %v1859_v4  ;;  %v1861_v56 = vmax.f32 %v1845_v6, 0.0  ;;  %v1849_v60 = vadd.f32 %v3178_v49, %v1743_v11  ;;  %v1745_v50 = vpop.f32.mrb[7].mxu0 }
 0x20e   : >> { %v1896_v58 = vmul.f32 %v1877_v51, %v1860_v55  ;;  %v1862_v61 = vmax.f32 %v1846_v9, 0.0  ;;  %v1850_v48 = vadd.f32 %v3178_v49, %v1745_v50  ;;  %v1792_v2 = vpop.f32.mrb[4].mxu1 }
 0x20f   : >> { %v1923_v63 = vadd.f32 %v1895_v46, %v1891_v7  ;;  %v1897_v0 = vmul.f32 %v1882_v62, %v1861_v56  ;;  %v1865_v1 = vmax.f32 %v1849_v60, 0.0  ;;  %v1847_v5 = vadd.f32 %v1830_v57, %v1792_v2  ;;  %v1794_v8 = vpop.f32.mrb[5].mxu1 }
 0x210   : >> { %v1932_v3 = vadd.f32 %v1896_v58, %v1892_v44  ;;  %v1898_v52 = vmul.f32 %v1882_v62, %v1862_v61  ;;  %v1866_v16 = vmax.f32 %v1850_v48, 0.0  ;;  %v1848_v6 = vadd.f32 %v1830_v57, %v1794_v8  ;;  %v1796_v4 = vpop.f32.mrb[6].mxu1 }
 0x211   : >> { %v1906_v11 = vadd.f32 %v1905_v59, %v1897_v0  ;;  %v1901_v12 = vmul.f32 %v1887_v10, %v1865_v1  ;;  %v1863_v53 = vmax.f32 %v1847_v5, 0.0  ;;  %v1851_v51 = vadd.f32 %v3178_v49, %v1796_v4  ;;  %v1798_v9 = vpop.f32.mrb[7].mxu1 }
 0x212   : >> { %v1915_v54 = vadd.f32 %v1914_v45, %v1898_v52  ;;  %v1902_v55 = vmul.f32 %v1887_v10, %v1866_v16  ;;  %v1864_v50 = vmax.f32 %v1848_v6, 0.0  ;;  %v1852_v7 = vadd.f32 %v3178_v49, %v1798_v9 }
 0x213   : >> { %v1907_v46 = vadd.f32 %v1906_v11, %v1901_v12  ;;  %v1899_v56 = vmul.f32 %v1882_v62, %v1863_v53  ;;  %v1867_v60 = vmax.f32 %v1851_v51, 0.0 }
 0x214   : >> { %v1916_v44 = vadd.f32 %v1915_v54, %v1902_v55  ;;  %v1900_v58 = vmul.f32 %v1882_v62, %v1864_v50  ;;  %v1868_v61 = vmax.f32 %v1852_v7, 0.0 }
 0x215   : >> { %v1908_v48 = vrot.slane %v1907_v46, 4  ;;  %v1924_v57 = vadd.f32 %v1923_v63, %v1899_v56  ;;  %v1903_v2 = vmul.f32 %v1887_v10, %v1867_v60  ;;  %v1941_v63 = vstv %s2875_s28  ;;  %s2465_s28 = sshll.u32 (%p308_p12), %s2554_s14, 4  ;;  %s2466_s28 = int_to_ptr.vmem [resolvable:$false] %s2465_s28 }
 0x216   : >> { %v1917_v59 = vrot.slane %v1916_v44, 4  ;;  %v1933_v0 = vadd.f32 %v1932_v3, %v1900_v58  ;;  %v1904_v1 = vmul.f32 %v1887_v10, %v1868_v61  ;;  %s2467_s9 = scalar_lea.vmem (%p308_p12), %s2466_s28, 512  ;;  %p2468_p2 = scmp.lt.s32.totalorder (%p308_p12), %s2025_s15, %s2466_s28 }
 0x217   : >> { %v1909_v5 = vadd.f32 %v1908_v48, %v1907_v46  ;;  %v1925_v8 = vadd.f32 %v1924_v57, %v1903_v2  ;;  %p2469_p3 = scmp.lt.s32.totalorder (%p308_p12), %s2467_s9, %s2461_s17 }
 0x218   : >> { %v1918_v45 = vadd.f32 %v1917_v59, %v1916_v44  ;;  %v1934_v52 = vadd.f32 %v1933_v0, %v1904_v1 }
 0x219   : >> { %v1910_v16 = vrot.slane %v1909_v5, 2  ;;  %v1926_v6 = vrot.slane %v1925_v8, 4  ;;  %p2470_p5 = por (%p308_p12), %p2469_p3, %p2468_p2 }
 0x21a   : >> { %v1919_v49 = vrot.slane %v1918_v45, 2  ;;  %v1935_v12 = vrot.slane %v1934_v52, 4 }
 0x21b   : >> { %v1911_v4 = vadd.f32 %v1910_v16, %v1909_v5  ;;  %v1927_v11 = vadd.f32 %v1926_v6, %v1925_v8  ;;  %p2471_p6 = pnand (%p308_p12), %p2470_p5, %p2464_p1 }
 0x21c   : >> { %v1920_v53 = vadd.f32 %v1919_v49, %v1918_v45  ;;  %v1936_v62 = vadd.f32 %v1935_v12, %v1934_v52  ;;  %v2553_v49 = vmov 1966171168  }
 0x21d   : >> { %v1912_v51 = vrot.slane %v1911_v4, 1  ;;  %v1928_v9 = vrot.slane %v1927_v11, 2  ;;  %v1977_v12 = vunpack.c.l.s4 %v2553_v49 }
 0x21e   : >> { %v1921_v54 = vrot.slane %v1920_v53, 1  ;;  %v1937_v55 = vrot.slane %v1936_v62, 2 }
 0x21f   : >> { %v1913_v3 = vadd.f32 %v1912_v51, %v1911_v4  ;;  %v1929_v50 = vadd.f32 %v1928_v9, %v1927_v11 }
 0x220   : >> { %v1922_v10 = vadd.f32 %v1921_v54, %v1920_v53  ;;  %v1938_v7 = vadd.f32 %v1937_v55, %v1936_v62  ;;  %v1978_v53 = vunpack.c.0.s8 %v1977_v12 }
 0x221   : >> { %v1942_v46 = vadd.f32 %v1941_v63, %v1913_v3  ;;  %v1930_v56 = vrot.slane %v1929_v50, 1 }
 0x222   : >> { %v1943_v60 = vadd.f32 %v1941_v63, %v1922_v10  ;;  %v1939_v44 = vrot.slane %v1938_v7, 1  ;;  %v1981_v51 = vsub.s32 %v1978_v53, %v2887_v47 }
 0x223   : >> { %v2233_v58 = vmul.f32 -1.442695, %v1942_v46  ;;  %v1931_v61 = vadd.f32 %v1930_v56, %v1929_v50  ;;  %v3283_v46 = vlaneseq }
 0x224   : >> { %v2234_v48 = vmul.f32 -1.442695, %v1943_v60  ;;  %v1940_v57 = vadd.f32 %v1939_v44, %v1938_v7 }
 0x225   : >> { %2445 = vpow2.f32 %v2233_v58  ;;  %v1944_v2 = vadd.f32 %v1941_v63, %v1931_v61  ;;  %vm2004_vm4 = vcmp.lt.s32.totalorder %v3283_v46, 512 }
 0x226   : >> { %2447 = vpow2.f32 %v2234_v48  ;;  %v1945_v59 = vadd.f32 %v1941_v63, %v1940_v57 }
 0x227   : >> { %v2235_v0 = vmul.f32 -1.442695, %v1944_v2 }
 0x228   : >> { %v2236_v1 = vmul.f32 -1.442695, %v1945_v59 }
 0x229   : >> { %2449 = vpow2.f32 %v2235_v0 }
 0x22a   : >> { %2451 = vpow2.f32 %v2236_v1 }
 0x22f   : >> { %v2446_v5 = vpop.eup %2445 }
 0x230   : >> { %v2448_v8 = vpop.eup %2447  ;;  %v1958_v45 = vadd.f32 1.0, %v2446_v5 }
 0x231   : >> { %v1959_v52 = vadd.f32 1.0, %v2448_v8 }
 0x232   : >> { %2453 = vrcp.f32 %v1958_v45 }
 0x233   : >> { %v2450_v16 = vpop.eup %2449  ;;  %2455 = vrcp.f32 %v1959_v52 }
 0x234   : >> { %v2452_v6 = vpop.eup %2451  ;;  %v1960_v4 = vadd.f32 1.0, %v2450_v16 }
 0x235   : >> { %v1961_v11 = vadd.f32 1.0, %v2452_v6 }
 0x236   : >> { %2457 = vrcp.f32 %v1960_v4 }
 0x237   : >> { %2459 = vrcp.f32 %v1961_v11 }
 0x23c   : >> { %v2454_v62 = vpop.eup %2453 }
 0x23d   : >> { %v2456_v9 = vpop.eup %2455 }
 0x23e   : >> { %v1974_v63 = vcombine.low %v2454_v62, %v2456_v9 }
 0x240   : >> { %v2458_v54 = vpop.eup %2457  ;;  %v1982_v55 = vrot.slane %v1974_v63, %v1981_v51 }
 0x241   : >> { %v2460_v3 = vpop.eup %2459 }
 0x242   : >> { %v1975_v50 = vcombine.low %v2458_v54, %v2460_v3 }
 0x244   : >> { %v1989_v10 = vrot.slane %v1975_v50, %v1981_v51  ;;  %310 = sbr.rel (!%p308_p12) target bundleno = 42 (0x2a), region = 94 }
 0x246   : >> { %v1990_v7 = vcombine.low %v1982_v55, %v1989_v10 }
 0x248   : >> { %v1997_v56 = vrot.slane %v1990_v7, %v1981_v51 }
 0x24a   : >> { %2006 = vst.msk [vmem:[%s2001_s18] sm:$0xf] %vm2004_vm4, %v1997_v56 }
 0x24b   : > { %2474 = shalt.err (!%p2471_p6)
}
 0x24c   : > { %s2475_s23 = scalar_lea.hbm %s3198_s12, 256  ;;  %s2479_s30 = scalar_lea.hbm %s3248_s5, 512 }
 0x24d   : > { %p2476_p7 = scmp.ne.s32.totalorder %s3198_s12, %s2475_s23  ;;  %p2480_p11 = scmp.lt.u32.totalorder %s3198_s12, %s3248_s5 }
 0x24e   : > { %p2481_p12 = scmp.lt.u32.totalorder %s2479_s30, %s2475_s23  ;;  %p2483_p0 = scmp.lt.u32.totalorder %s2475_s23, %s3198_s12 }
 0x24f   : > { %p2477_p9 = pnand %p2476_p7, %p2628_p4 }
 0x250   : > { %p2482_p13 = por %p2481_p12, %p2480_p11 }
 0x251   : > { %p2478_p10 = pneg %p2477_p9 }
 0x252   : > { %p2484_p1 = por %p2483_p0, %p2482_p13 }
 0x254   : > { %p2485_p2 = pnand %p2484_p1, %p2478_p10 }
 0x256   : > { %2488 = shalt.err (!%p2485_p2)
}
 0x257   : > { %2372 = dma.vmem_to_hbm [thread:$0]  (%p2628_p4), %s2025_s15, 256, %s3198_s12, %s2008_s16  }
 0x258 PF: > { %p2378_p3 = scmp.ge.s32.totalorder %s2543_s25, 2  ;;  %s2036_s18 = sand.u32 1, %s2523_s20  }
 0x259   : > { %s2037_s11 = scalar_lea.sflag [#allocation4], %s2036_s18 }
 0x25a   : > { %p2375_p5 = pnand %p2378_p3, %p2635_p8 }
 0x25c   : > { %2518 = dma.done.wait (!%p2375_p5), %s2037_s11, 256  }
 0x25d   : > { %2520 = vsyncadd (!%p2375_p5), %s2037_s11, 4294967040  ;;  %s19_s25 = sadd.s32 1, %s2543_s25   ;;  %s3284_s20 = smov %s2527_s21 }
 0x25e   : > { %p16_p6 = scmp.ge.s32.totalorder %s19_s25, 4   ;;  %s3285_s21 = smov %s2531_s22 }
 0x25f   : > { %s3286_s22 = smov %s2641_s7  ;;  %s3287_s23 = smov %s2539_s24 }
 0x260   : > { %s3288_s24 = smov %s3290_s27  ;;  %18 = sbr.rel (!%p16_p6) target bundleno = 6 (0x6), region = 105 }
 0x267   :  { %2042 = vsyncpa [#allocation4], 1 }
 0x268   :  { %2044 = vsyncpa [#allocation4 + $0x1], 1 }

</bundles_post_ra>
